<compile_context>
chip_gen: v7x
topology: tpu7x:2x2x1
jax: 0.10.0
libtpu: 0.0.40
codegen_flags: <defaults>
</compile_context>

<pallas_src>
import jax
import jax.numpy as jnp
from jax.experimental import pallas as pl
from jax.experimental.pallas import tpu as pltpu


def _mlp_kernel(x_ref, w1_ref, b1_ref, w2_ref, b2_ref, w3_ref, b3_ref, ot_ref):
    """One batch tile.  x in natural layout, activations kept transposed.

    x_ref  : (TILE_B, IN)  input dtype         ot_ref : (O, TILE_B) f32
    w1_ref : (H1, IN)      compute dtype       b1_ref : (H1, 1) f32
    w2_ref : (H2, H1)      compute dtype       b2_ref : (H2, 1) f32
    w3_ref : (H2, O)       compute dtype       b3_ref : (O,  1) f32
    """
    cdt = w1_ref.dtype
    x = x_ref[...].astype(cdt)   # in-kernel cast: VPU-only, no extra HBM pass

    # Layer 1: contract the IN axis of both operands -> (H1, TILE_B).
    # Batch lands in the lane dim; any transpose Mosaic inserts stays in VMEM.
    h1 = jax.lax.dot_general(
        w1_ref[...], x,
        dimension_numbers=(((1,), (1,)), ((), ())),
        preferred_element_type=jnp.float32) + b1_ref[...]
    h1 = jnp.maximum(h1, 0.0)
    # Dropout(0.2): identity in eval/inference mode.

    # Layer 2: (H2, H1) @ (H1, TILE_B) -> (H2, TILE_B).
    h2 = jnp.dot(w2_ref[...], h1.astype(cdt),
                 preferred_element_type=jnp.float32) + b2_ref[...]
    h2 = jnp.maximum(h2, 0.0)
    # Dropout(0.2): identity in eval/inference mode.

    # Layer 3: output_size == 1 makes an MXU matmul pathological (N=1),
    # so compute it on the VPU (multiply) + XLU (sublane reduce) instead.
    if w3_ref.shape[1] == 1:
        out = jnp.sum(h2 * w3_ref[...].astype(jnp.float32), axis=0, keepdims=True)
    else:  # general output_size: contract the H2 (sublane) axis of both.
        out = jax.lax.dot_general(
            w3_ref[...], h2.astype(cdt),
            dimension_numbers=(((0,), (0,)), ((), ())),
            preferred_element_type=jnp.float32)
    ot_ref[...] = out + b3_ref[...]


def _xla_forward(x, p):
    """Plain-XLA reference / small-batch fallback (eval-mode forward)."""
    h = jnp.maximum(x @ p["w1"].T + p["b1"].T, 0.0)
    h = jnp.maximum(h @ p["w2"].T + p["b2"].T, 0.0)
    return h @ p["w3"] + p["b3"].T


def nba_predictor_forward(x, params, *, tile_b=16384, compute_dtype=jnp.bfloat16,
                          use_pallas=None, min_pallas_batch=4096):
    """NBAPredictor forward pass (eval mode).

    x:       (batch, input_size), streamed in its natural layout & dtype.
    params:  dict with w1 (H1,IN), b1 (H1,1), w2 (H2,H1), b2 (H2,1),
             w3 (H2,O), b3 (O,1)   (w1/w2 in PyTorch (out,in) layout).
    returns: (batch, O) float32.
    """
    batch, in_size = x.shape
    h1_size = params["w1"].shape[0]
    h2_size = params["w2"].shape[0]
    out_size = params["w3"].shape[1]

    if use_pallas is None:          # tiny batches: launch overhead dominates
        use_pallas = batch >= min_pallas_batch
    if not use_pallas:
        return _xla_forward(x, params)

    # Batch (lane) tile: multiple of 128, no bigger than needed.
    # Sweep 16384-32768 at large batch; ~16 MiB live VMEM at 16384/f32.
    tile_b = max(128, (tile_b // 128) * 128)
    tile_b = min(tile_b, pl.cdiv(batch, 128) * 128)
    grid = (pl.cdiv(batch, tile_b),)      # ragged final block handled by Pallas

    w1 = params["w1"].astype(compute_dtype)
    w2 = params["w2"].astype(compute_dtype)
    w3 = params["w3"].astype(compute_dtype)
    b1 = params["b1"].astype(jnp.float32)
    b2 = params["b2"].astype(jnp.float32)
    b3 = params["b3"].astype(jnp.float32)

    x_bytes = jnp.dtype(x.dtype).itemsize
    w_bytes = jnp.dtype(compute_dtype).itemsize
    cost = pl.CostEstimate(
        flops=2 * batch * (in_size * h1_size + h1_size * h2_size + h2_size * out_size),
        transcendentals=0,
        bytes_accessed=(batch * in_size * x_bytes            # x streamed in
                        + batch * out_size * 4               # out streamed back
                        + (w1.size + w2.size + w3.size) * w_bytes
                        + (b1.size + b2.size + b3.size) * 4),
    )

    out_t = pl.pallas_call(
        _mlp_kernel,
        out_shape=jax.ShapeDtypeStruct((out_size, batch), jnp.float32),
        grid=grid,
        in_specs=[
            # x tile: natural (batch, feature) layout, streamed / double-buffered.
            pl.BlockSpec((tile_b, in_size), lambda i: (i, 0)),
            # parameters: constant block index -> fetched once, VMEM-resident.
            pl.BlockSpec((h1_size, in_size), lambda i: (0, 0)),
            pl.BlockSpec((h1_size, 1), lambda i: (0, 0)),
            pl.BlockSpec((h2_size, h1_size), lambda i: (0, 0)),
            pl.BlockSpec((h2_size, 1), lambda i: (0, 0)),
            pl.BlockSpec((h2_size, out_size), lambda i: (0, 0)),
            pl.BlockSpec((out_size, 1), lambda i: (0, 0)),
        ],
        out_specs=pl.BlockSpec((out_size, tile_b), lambda i: (0, i)),
        compiler_params=pltpu.CompilerParams(
            dimension_semantics=("parallel",),      # 2-TC split on v7x; no-op v5e/v6e
            vmem_limit_bytes=48 * 1024 * 1024),     # big tiles vs v5e's 16 MiB default,
                                                    # still < v7x's 64 MiB per TC
        cost_estimate=cost,
    )(x, w1, b1, w2, b2, w3, b3)

    return out_t.T


def init_params(key, input_size=15, hidden_size=64, output_size=1):
    """Matches the PyTorch module init: xavier_normal_ weights, zero biases.
    w1/w2 stored in PyTorch (out,in) layout; w3 stored (in,out) so the kernel's
    layer-3 VPU path needs no transpose."""
    k1, k2, k3 = jax.random.split(key, 3)

    def xavier_normal(k, shape, fan_in, fan_out):
        std = (2.0 / (fan_in + fan_out)) ** 0.5
        return std * jax.random.normal(k, shape, dtype=jnp.float32)

    h = hidden_size
    h2 = hidden_size // 2
    return {
        "w1": xavier_normal(k1, (h, input_size), input_size, h),
        "b1": jnp.zeros((h, 1), jnp.float32),
        "w2": xavier_normal(k2, (h2, h), h, h2),
        "b2": jnp.zeros((h2, 1), jnp.float32),
        "w3": xavier_normal(k3, (h2, output_size), h2, output_size),
        "b3": jnp.zeros((output_size, 1), jnp.float32),
    }


if __name__ == "__main__":
    key = jax.random.PRNGKey(0)
    kx, kp = jax.random.split(key)

    input_size, hidden_size, output_size = 15, 64, 1
    params = init_params(kp, input_size, hidden_size, output_size)

    batch = 256
    x = jax.random.normal(kx, (batch, input_size), dtype=jnp.float32)
    ref = _xla_forward(x, params)

    # 1) Pallas path, f32 compute (tight numeric check).
    out_f32 = jax.block_until_ready(
        nba_predictor_forward(x, params, compute_dtype=jnp.float32, use_pallas=True))
    assert out_f32.shape == (batch, output_size)
    assert jnp.allclose(out_f32, ref, atol=1e-4, rtol=1e-4), "f32 mismatch vs reference"

    # 2) Pallas path, default bf16 MXU feed (f32 accumulation; loose check).
    out_bf16 = jax.block_until_ready(nba_predictor_forward(x, params, use_pallas=True))
    assert jnp.allclose(out_bf16, ref, atol=3e-2, rtol=3e-2), "bf16 mismatch vs reference"

    # 3) Ragged batch (partial final block) through the Pallas path.
    xr = jax.random.normal(kx, (200, input_size), dtype=jnp.float32)
    out_r = jax.block_until_ready(
        nba_predictor_forward(xr, params, compute_dtype=jnp.float32, use_pallas=True))
    assert jnp.allclose(out_r, _xla_forward(xr, params), atol=1e-4, rtol=1e-4), \
        "ragged-batch mismatch vs reference"

    # 4) Small-batch auto path (plain-XLA fallback).
    xs = jax.random.normal(kx, (8, input_size), dtype=jnp.float32)
    out_s = jax.block_until_ready(nba_predictor_forward(xs, params))
    assert out_s.shape == (8, output_size)

    print("KERNEL_OK")
</pallas_src>

<mosaic_0001>
module attributes {stable_mosaic.version = 11 : i64} {
  func.func @_mlp_kernel(%arg0: i32, %arg1: memref<256x15xf32, #tpu.memory_space<vmem>>, %arg2: memref<64x15xf32, #tpu.memory_space<vmem>>, %arg3: memref<64x1xf32, #tpu.memory_space<vmem>>, %arg4: memref<32x64xf32, #tpu.memory_space<vmem>>, %arg5: memref<32x1xf32, #tpu.memory_space<vmem>>, %arg6: memref<32x1xf32, #tpu.memory_space<vmem>>, %arg7: memref<1x1xf32, #tpu.memory_space<vmem>>, %arg8: memref<1x256xf32, #tpu.memory_space<vmem>>) attributes {dimension_semantics = [#tpu.dimension_semantics<parallel>], iteration_bounds = array<i64: 1>, scalar_prefetch = 0 : i64, scratch_operands = 0 : i64, tpu.core_type = #tpu.core_type<tc>, window_params = [{transform_indices = @transform_0, window_bounds = array<i64: 256, 15>}, {pipeline_mode = #tpu.pipeline_mode<synchronous>, transform_indices = @transform_1, window_bounds = array<i64: 64, 15>}, {pipeline_mode = #tpu.pipeline_mode<synchronous>, transform_indices = @transform_2, window_bounds = array<i64: 64, 1>}, {pipeline_mode = #tpu.pipeline_mode<synchronous>, transform_indices = @transform_3, window_bounds = array<i64: 32, 64>}, {pipeline_mode = #tpu.pipeline_mode<synchronous>, transform_indices = @transform_4, window_bounds = array<i64: 32, 1>}, {pipeline_mode = #tpu.pipeline_mode<synchronous>, transform_indices = @transform_5, window_bounds = array<i64: 32, 1>}, {pipeline_mode = #tpu.pipeline_mode<synchronous>, transform_indices = @transform_6, window_bounds = array<i64: 1, 1>}, {transform_indices = @transform_7, window_bounds = array<i64: 1, 256>}]} {
    %c0 = arith.constant 0 : index
    %c0_0 = arith.constant 0 : index
    %0 = vector.load %arg1[%c0, %c0_0] : memref<256x15xf32, #tpu.memory_space<vmem>>, vector<256x15xf32>
    %c0_1 = arith.constant 0 : index
    %c0_2 = arith.constant 0 : index
    %1 = vector.load %arg2[%c0_1, %c0_2] : memref<64x15xf32, #tpu.memory_space<vmem>>, vector<64x15xf32>
    %cst = arith.constant dense<0.000000e+00> : vector<64x256xf32>
    %2 = tpu.matmul %1, %0, %cst {dimension_numbers = #tpu.dot_dimension_numbers<[1], [1], [0], [0], [0, 0, 1, 0], [], []>} : vector<64x15xf32>, vector<256x15xf32>, vector<64x256xf32> -> vector<64x256xf32>
    %c0_3 = arith.constant 0 : index
    %c0_4 = arith.constant 0 : index
    %3 = vector.load %arg3[%c0_3, %c0_4] : memref<64x1xf32, #tpu.memory_space<vmem>>, vector<64x1xf32>
    %4 = vector.broadcast %3 : vector<64x1xf32> to vector<64x256xf32>
    %5 = arith.addf %2, %4 : vector<64x256xf32>
    %cst_5 = arith.constant 0.000000e+00 : f32
    %6 = vector.broadcast %cst_5 : f32 to vector<64x256xf32>
    %7 = arith.maximumf %5, %6 : vector<64x256xf32>
    %c0_6 = arith.constant 0 : index
    %c0_7 = arith.constant 0 : index
    %8 = vector.load %arg4[%c0_6, %c0_7] : memref<32x64xf32, #tpu.memory_space<vmem>>, vector<32x64xf32>
    %cst_8 = arith.constant dense<0.000000e+00> : vector<32x256xf32>
    %9 = tpu.matmul %8, %7, %cst_8 {dimension_numbers = #tpu.dot_dimension_numbers<[1], [0], [0], [1], [0, 0, 1, 1], [], []>} : vector<32x64xf32>, vector<64x256xf32>, vector<32x256xf32> -> vector<32x256xf32>
    %c0_9 = arith.constant 0 : index
    %c0_10 = arith.constant 0 : index
    %10 = vector.load %arg5[%c0_9, %c0_10] : memref<32x1xf32, #tpu.memory_space<vmem>>, vector<32x1xf32>
    %11 = vector.broadcast %10 : vector<32x1xf32> to vector<32x256xf32>
    %12 = arith.addf %9, %11 : vector<32x256xf32>
    %cst_11 = arith.constant 0.000000e+00 : f32
    %13 = vector.broadcast %cst_11 : f32 to vector<32x256xf32>
    %14 = arith.maximumf %12, %13 : vector<32x256xf32>
    %c0_12 = arith.constant 0 : index
    %c0_13 = arith.constant 0 : index
    %15 = vector.load %arg6[%c0_12, %c0_13] : memref<32x1xf32, #tpu.memory_space<vmem>>, vector<32x1xf32>
    %16 = vector.broadcast %15 : vector<32x1xf32> to vector<32x256xf32>
    %17 = arith.mulf %14, %16 : vector<32x256xf32>
    %cst_14 = arith.constant dense<0.000000e+00> : vector<256xf32>
    %18 = vector.multi_reduction <add>, %17, %cst_14 [0] : vector<32x256xf32> to vector<256xf32>
    %19 = vector.shape_cast %18 : vector<256xf32> to vector<1x256xf32>
    %c0_15 = arith.constant 0 : index
    %c0_16 = arith.constant 0 : index
    %20 = vector.load %arg7[%c0_15, %c0_16] : memref<1x1xf32, #tpu.memory_space<vmem>>, vector<1x1xf32>
    %21 = vector.broadcast %20 : vector<1x1xf32> to vector<1x256xf32>
    %22 = arith.addf %19, %21 : vector<1x256xf32>
    %c0_17 = arith.constant 0 : index
    %c0_18 = arith.constant 0 : index
    %23 = vector.load %arg8[%c0_17, %c0_18] : memref<1x256xf32, #tpu.memory_space<vmem>>, vector<1x256xf32>
    tpu.vector_store %arg8[%c0_17, %c0_18], %22 {strides = array<i32>} : memref<1x256xf32, #tpu.memory_space<vmem>>, vector<1x256xf32>,
    return
  }
  func.func @transform_0(%arg0: i32) -> (i32, i32) {
    %c0_i32 = arith.constant 0 : i32
    %c0_i32_0 = arith.constant 0 : i32
    return %arg0, %c0_i32 : i32, i32
  }
  func.func @transform_1(%arg0: i32) -> (i32, i32) {
    %c0_i32 = arith.constant 0 : i32
    %c0_i32_0 = arith.constant 0 : i32
    %c0_i32_1 = arith.constant 0 : i32
    return %c0_i32, %c0_i32_0 : i32, i32
  }
  func.func @transform_2(%arg0: i32) -> (i32, i32) {
    %c0_i32 = arith.constant 0 : i32
    %c0_i32_0 = arith.constant 0 : i32
    %c0_i32_1 = arith.constant 0 : i32
    return %c0_i32, %c0_i32_0 : i32, i32
  }
  func.func @transform_3(%arg0: i32) -> (i32, i32) {
    %c0_i32 = arith.constant 0 : i32
    %c0_i32_0 = arith.constant 0 : i32
    %c0_i32_1 = arith.constant 0 : i32
    return %c0_i32, %c0_i32_0 : i32, i32
  }
  func.func @transform_4(%arg0: i32) -> (i32, i32) {
    %c0_i32 = arith.constant 0 : i32
    %c0_i32_0 = arith.constant 0 : i32
    %c0_i32_1 = arith.constant 0 : i32
    return %c0_i32, %c0_i32_0 : i32, i32
  }
  func.func @transform_5(%arg0: i32) -> (i32, i32) {
    %c0_i32 = arith.constant 0 : i32
    %c0_i32_0 = arith.constant 0 : i32
    %c0_i32_1 = arith.constant 0 : i32
    return %c0_i32, %c0_i32_0 : i32, i32
  }
  func.func @transform_6(%arg0: i32) -> (i32, i32) {
    %c0_i32 = arith.constant 0 : i32
    %c0_i32_0 = arith.constant 0 : i32
    %c0_i32_1 = arith.constant 0 : i32
    return %c0_i32, %c0_i32_0 : i32, i32
  }
  func.func @transform_7(%arg0: i32) -> (i32, i32) {
    %c0_i32 = arith.constant 0 : i32
    %c0_i32_0 = arith.constant 0 : i32
    return %c0_i32, %arg0 : i32, i32
  }
}

</mosaic_0001>

<bundles_post_ra>
// kernel: tpu_custom_call.1
= control target key start
LH: loop header
LB: loop body
LE: loop exit
PB: predicated region body
PF: predicated region fallthrough
CT: control target
= control target key end

     0   :  { %s1091_s0 = inlined_call_operand.vmem [shape: f32[256,15], index: 0, kind: input, shape index: {}]   ;;  %s1092_s1 = inlined_call_operand.vmem [shape: f32[64,15], index: 1, kind: input, shape index: {}]   ;;  %s1093_s2 = inlined_call_operand.vmem [shape: f32[64,1], index: 2, kind: input, shape index: {}]   ;;  %s1094_s3 = inlined_call_operand.vmem [shape: f32[32,64], index: 3, kind: input, shape index: {}]   ;;  %s1095_s4 = inlined_call_operand.vmem [shape: f32[32,1], index: 4, kind: input, shape index: {}]   ;;  %s1096_s5 = inlined_call_operand.vmem [shape: f32[32,1], index: 5, kind: input, shape index: {}]   ;;  %s1097_s6 = inlined_call_operand.<no memory space> [shape: f32[1,1], index: 6, kind: input, shape index: {}]   ;;  %s1098_s7 = inlined_call_operand.hbm [shape: f32[1,256], index: 7, kind: output, shape index: {}]  }
   0x1   :  { %v12_v0 = vstv %s1097_s6 }
   0x2   :  { %13 = vst [vmem:[#allocation2] sm:$0x1] %v12_v0 }
   0x3   :  { %v45_v1 = vld [vmem:[%s1091_s0 + $0x80] sm:$0xff]  ;;  %v46_v2 = vld [vmem:[%s1091_s0 + $0x88] sm:$0xff]  ;;  %vm117_vm0 = vcmask 121856   ;;  %v47_v7 = vld [vmem:[%s1091_s0 + $0x90] sm:$0xff]  ;;  %v790_v8 = vmov 0  }
   0x4   :  { %v29_v3 = vld [vmem:[%s1091_s0] sm:$0xff]  ;;  %v696_v4 = vpack.c.bf16 %v46_v2, %v45_v1  ;;  %vm848_vm1 = vmpackc.low %vm117_vm0, %vm117_vm0  ;;  %v30_v6 = vld [vmem:[%s1091_s0 + $0x8] sm:$0xff]  ;;  %764 = vset.pattern.permute.xlu0 %v790_v8  ;;  %765 = vset.pattern.permute.xlu1 %v790_v8 }
   0x5   :  { %v699_v9 = vpack.c.bf16 %v30_v6, %v29_v3  ;;  %v48_v10 = vld [vmem:[%s1091_s0 + $0x98] sm:$0xff]  ;;  %v31_v12 = vld [vmem:[%s1091_s0 + $0x10] sm:$0xff]  ;;  %v49_v14 = vld [vmem:[%s1091_s0 + $0xa0] sm:$0xff] }
   0x6   :  { %698 = vmatprep.subr.msk.bf16.mxu0 %vm848_vm1, %v696_v4  ;;  %v702_v11 = vpack.c.bf16 %v48_v10, %v47_v7  ;;  %v32_v13 = vld [vmem:[%s1091_s0 + $0x18] sm:$0xff]  ;;  %v50_v15 = vld [vmem:[%s1091_s0 + $0xa8] sm:$0xff]  ;;  %v882_v18 = vld [vmem:[%s1092_s1] sm:$0xff] }
   0x7   :  { %701 = vmatpush3.bf16.xpose.msk.msra.mxu0 %vm848_vm1, %v699_v9  ;;  %v705_v16 = vpack.c.bf16 %v32_v13, %v31_v12  ;;  %v708_v17 = vpack.c.bf16 %v50_v15, %v49_v14  ;;  %680 = vmatprep.mubr.msk.f32.mxu0 %vm117_vm0, %v882_v18  ;;  %v33_v19 = vld [vmem:[%s1091_s0 + $0x20] sm:$0xff]  ;;  %v34_v20 = vld [vmem:[%s1091_s0 + $0x28] sm:$0xff]  ;;  %v51_v22 = vld [vmem:[%s1091_s0 + $0xb0] sm:$0xff] }
   0x8   :  { %704 = vmatprep.subr.msk.bf16.mxu0 %vm848_vm1, %v702_v11  ;;  %v69_v21 = vld [vmem:[%s1093_s2] sm:$0xff]  ;;  %v52_v23 = vld [vmem:[%s1091_s0 + $0xb8] sm:$0xff]  ;;  %v71_v24 = vld [vmem:[%s1093_s2 + $0x10] sm:$0xff]  ;;  %v711_v26 = vpack.c.bf16 %v34_v20, %v33_v19 }
   0x9   :  { %79 = vperm.xlu0 %764, %v69_v21   ;;  %v70_v25 = vld [vmem:[%s1093_s2 + $0x8] sm:$0xff]  ;;  %89 = vperm.xlu1 %765, %v71_v24   ;;  %v72_v27 = vld [vmem:[%s1093_s2 + $0x18] sm:$0xff]  ;;  %v714_v28 = vpack.c.bf16 %v52_v23, %v51_v22  ;;  %v73_v29 = vld [vmem:[%s1093_s2 + $0x20] sm:$0xff] }
   0xd   :  { %84 = vperm.xlu0 %764, %v70_v25   ;;  %94 = vperm.xlu1 %765, %v72_v27  }
   0xf   :  { %707 = vmatpush3.bf16.xpose.msk.msra.mxu0 %vm848_vm1, %v705_v16 }
  0x10   :  { %710 = vmatprep.subr.msk.bf16.mxu0 %vm848_vm1, %v708_v17 }
  0x11   :  { %14 = vsyncpa [#allocation4], 0  ;;  %v74_v30 = vld [vmem:[%s1093_s2 + $0x28] sm:$0xff]  ;;  %v35_v31 = vld [vmem:[%s1091_s0 + $0x30] sm:$0xff]  ;;  %99 = vperm.xlu0 %764, %v73_v29   ;;  %v791_v12 = vmov 0.0   ;;  %vm395_vm2 = vcmask 523264  }
  0x12   :  { %v36_v32 = vld [vmem:[%s1091_s0 + $0x38] sm:$0xff]  ;;  %v53_v33 = vld [vmem:[%s1091_s0 + $0xc0] sm:$0xff]  ;;  %v54_v34 = vld [vmem:[%s1091_s0 + $0xc8] sm:$0xff]  ;;  %104 = vperm.xlu1 %765, %v74_v30   ;;  %472 = vmatprep.mubr.f32.mxu1 %v791_v12 }
  0x13   :  { %v75_v35 = vld [vmem:[%s1093_s2 + $0x30] sm:$0xff]  ;;  %v717_v36 = vpack.c.bf16 %v36_v32, %v35_v31  ;;  %v76_v37 = vld [vmem:[%s1093_s2 + $0x38] sm:$0xff]  ;;  %v720_v38 = vpack.c.bf16 %v54_v34, %v53_v33  ;;  %v371_v39 = vld [vmem:[%s1095_s4] sm:$0xff] }
  0x14   :  { %v372_v40 = vld [vmem:[%s1095_s4 + $0x8] sm:$0xff]  ;;  %v37_v41 = vld [vmem:[%s1091_s0 + $0x40] sm:$0xff]  ;;  %v55_v43 = vld [vmem:[%s1091_s0 + $0xd0] sm:$0xff] }
  0x15   :  { %109 = vperm.xlu0 %764, %v75_v35   ;;  %v38_v42 = vld [vmem:[%s1091_s0 + $0x48] sm:$0xff]  ;;  %v56_v44 = vld [vmem:[%s1091_s0 + $0xd8] sm:$0xff]  ;;  %v373_v45 = vld [vmem:[%s1095_s4 + $0x10] sm:$0xff] }
  0x16   :  { %114 = vperm.xlu1 %765, %v76_v37   ;;  %v723_v46 = vpack.c.bf16 %v38_v42, %v37_v41  ;;  %v374_v47 = vld [vmem:[%s1095_s4 + $0x18] sm:$0xff]  ;;  %v726_v48 = vpack.c.bf16 %v56_v44, %v55_v43  ;;  %v505_v49 = vld [vmem:[%s1096_s5] sm:$0xff]  ;;  %v506_v50 = vld [vmem:[%s1096_s5 + $0x8] sm:$0xff] }
  0x17   :  { %713 = vmatpush3.bf16.xpose.msk.msra.mxu0 %vm848_vm1, %v711_v26  ;;  %v39_v51 = vld [vmem:[%s1091_s0 + $0x50] sm:$0xff]  ;;  %v40_v52 = vld [vmem:[%s1091_s0 + $0x58] sm:$0xff]  ;;  %v57_v53 = vld [vmem:[%s1091_s0 + $0xe0] sm:$0xff] }
  0x18   :  { %716 = vmatprep.subr.msk.bf16.mxu0 %vm848_vm1, %v714_v28  ;;  %v58_v54 = vld [vmem:[%s1091_s0 + $0xe8] sm:$0xff]  ;;  %v507_v55 = vld [vmem:[%s1096_s5 + $0x10] sm:$0xff]  ;;  %v729_v56 = vpack.c.bf16 %v40_v52, %v39_v51  ;;  %v508_v57 = vld [vmem:[%s1096_s5 + $0x18] sm:$0xff] }
  0x19   :  { %377 = vperm.xlu0 %764, %v371_v39   ;;  %v732_v58 = vpack.c.bf16 %v58_v54, %v57_v53  ;;  %v555_v59 = vld [vmem:[#allocation2] sm:$0x1]  ;;  %v42_v61 = vld [vmem:[%s1091_s0 + $0x68] sm:$0xff]  ;;  %v59_v62 = vld [vmem:[%s1091_s0 + $0xf0] sm:$0xff] }
  0x1a   :  { %382 = vperm.xlu1 %765, %v372_v40   ;;  %v41_v60 = vld [vmem:[%s1091_s0 + $0x60] sm:$0xff]  ;;  %v60_v63 = vld [vmem:[%s1091_s0 + $0xf8] sm:$0xff]  ;;  %v43_v2 = vld [vmem:[%s1091_s0 + $0x70] sm:$0xff] }
  0x1b   :  { %v735_v0 = vpack.c.bf16 %v42_v61, %v41_v60  ;;  %v738_v1 = vpack.c.bf16 %v60_v63, %v59_v62  ;;  %v44_v3 = vld [vmem:[%s1091_s0 + $0x78] sm:$0xff]  ;;  %v62_v6 = vld [vmem:[%s1092_s1 + $0x8] sm:$0xff]  ;;  %v63_v7 = vld [vmem:[%s1092_s1 + $0x10] sm:$0xff] }
  0x1c   :  { %v741_v4 = vpack.c.bf16 %v44_v3, %v43_v2  ;;  %v64_v5 = vld [vmem:[%s1092_s1 + $0x18] sm:$0xff]  ;;  %v65_v8 = vld [vmem:[%s1092_s1 + $0x20] sm:$0xff]  ;;  %v66_v9 = vld [vmem:[%s1092_s1 + $0x28] sm:$0xff] }
  0x1d   :  { %387 = vperm.xlu0 %764, %v373_v45   ;;  %v67_v10 = vld [vmem:[%s1092_s1 + $0x30] sm:$0xff]  ;;  %v68_v11 = vld [vmem:[%s1092_s1 + $0x38] sm:$0xff] }
  0x1e   :  { %392 = vperm.xlu1 %765, %v374_v47  }
  0x1f   :  { %719 = vmatpush3.bf16.xpose.msk.msra.mxu0 %vm848_vm1, %v717_v36 }
  0x20   :  { %722 = vmatprep.subr.msk.bf16.mxu0 %vm848_vm1, %v720_v38 }
  0x21   :  { %511 = vperm.xlu0 %764, %v505_v49  }
  0x22   :  { %516 = vperm.xlu1 %765, %v506_v50  }
  0x25   :  { %521 = vperm.xlu0 %764, %v507_v55  }
  0x26   :  { %526 = vperm.xlu1 %765, %v508_v57  }
  0x27   :  { %725 = vmatpush3.bf16.xpose.msk.msra.mxu0 %vm848_vm1, %v723_v46 }
  0x28   :  { %728 = vmatprep.subr.msk.bf16.mxu0 %vm848_vm1, %v726_v48 }
  0x29   :  { %558 = vperm.xlu0 %764, %v555_v59  }
  0x2f   :  { %731 = vmatpush3.bf16.xpose.msk.msra.mxu0 %vm848_vm1, %v729_v56 }
  0x30   :  { %734 = vmatprep.subr.msk.bf16.mxu0 %vm848_vm1, %v732_v58 }
  0x37   :  { %737 = vmatpush3.bf16.xpose.msk.msra.mxu0 %vm848_vm1, %v735_v0 }
  0x38   :  { %740 = vmatprep.subr.msk.bf16.mxu0 %vm848_vm1, %v738_v1 }
  0x3f   :  { %743 = vmatpush3.bf16.xpose.msk.msra.mxu0 %vm848_vm1, %v741_v4 }
  0x46   :  { %681 = vmatmul.mubr.msk.f32.vlgmr.msra.gmra.mrb[0].mxu0 %vm117_vm0, %v882_v18 }
  0x47   :  { %682 = vmatprep.mubr.msk.f32.mxu0 %vm117_vm0, %v62_v6 }
  0x4a   :  { %683 = vmatmul.mubr.msk.f32.gmra.mrb[2].mxu0 %vm117_vm0, %v62_v6 }
  0x4b   :  { %684 = vmatprep.mubr.msk.f32.mxu0 %vm117_vm0, %v63_v7 }
  0x4e   :  { %685 = vmatmul.mubr.msk.f32.gmra.mrb[4].mxu0 %vm117_vm0, %v63_v7 }
  0x4f   :  { %686 = vmatprep.mubr.msk.f32.mxu0 %vm117_vm0, %v64_v5 }
  0x52   :  { %687 = vmatmul.mubr.msk.f32.gmra.mrb[6].mxu0 %vm117_vm0, %v64_v5 }
  0x53   :  { %688 = vmatprep.mubr.msk.f32.mxu0 %vm117_vm0, %v65_v8 }
  0x56   :  { %689 = vmatmul.mubr.msk.f32.gmra.mrb[8].mxu0 %vm117_vm0, %v65_v8 }
  0x57   :  { %690 = vmatprep.mubr.msk.f32.mxu0 %vm117_vm0, %v66_v9 }
  0x5a   :  { %691 = vmatmul.mubr.msk.f32.gmra.mrb[10].mxu0 %vm117_vm0, %v66_v9 }
  0x5b   :  { %692 = vmatprep.mubr.msk.f32.mxu0 %vm117_vm0, %v67_v10 }
  0x5e   :  { %693 = vmatmul.mubr.msk.f32.gmra.mrb[12].mxu0 %vm117_vm0, %v67_v10 }
  0x5f   :  { %694 = vmatprep.mubr.msk.f32.mxu0 %vm117_vm0, %v68_v11 }
  0x62   :  { %695 = vmatmul.mubr.msk.f32.gmra.mrb[14].mxu0 %vm117_vm0, %v68_v11 }
  0x88   :  { %v80_v13 = vpop.permute.xlu0 %79  ;;  %v90_v22 = vpop.permute.xlu1 %89 }
  0x8c   :  { %v85_v17 = vpop.permute.xlu0 %84  ;;  %v95_v33 = vpop.permute.xlu1 %94 }
  0x90   :  { %v100_v46 = vpop.permute.xlu0 %99 }
  0x91   :  { %v105_v49 = vpop.permute.xlu1 %104 }
  0x94   :  { %v110_v62 = vpop.permute.xlu0 %109 }
  0x95   :  { %v115_v1 = vpop.permute.xlu1 %114 }
 0x119   :  { %v304_v14 = vpop.f32.mrb[0].mxu0 }
 0x11a   :  { %v306_v15 = vpop.f32.mrb[1].mxu0  ;;  %v305_v16 = vadd.f32 %v304_v14, %v80_v13  ;;  %v367_v14 = vld [vmem:[%s1094_s3] sm:$0xff] }
 0x11b   :  { %v307_v18 = vadd.f32 %v306_v15, %v80_v13  ;;  %v368_v15 = vld [vmem:[%s1094_s3 + $0x8] sm:$0xff] }
 0x11c   :  { %v351_v24 = vmax.f32 %v305_v16, 0.0  ;;  %v369_v16 = vld [vmem:[%s1094_s3 + $0x10] sm:$0xff] }
 0x11d   :  { %v310_v19 = vpop.f32.mrb[2].mxu0  ;;  %v352_v26 = vmax.f32 %v307_v18, 0.0  ;;  %v378_v18 = vpop.permute.xlu0 %377 }
 0x11e   :  { %v311_v20 = vadd.f32 %v310_v19, %v85_v17  ;;  %v312_v21 = vpop.f32.mrb[3].mxu0  ;;  %v383_v19 = vpop.permute.xlu1 %382 }
 0x11f   :  { %v313_v23 = vadd.f32 %v312_v21, %v85_v17  ;;  %v370_v17 = vld [vmem:[%s1094_s3 + $0x18] sm:$0xff]  ;;  %s793_s3 = smov [#allocation3]  }
 0x120   :  { %v353_v25 = vmax.f32 %v311_v20, 0.0  ;;  %s596_s5 = sshll.u32 %s793_s3, 4  ;;  %s597_s5 = int_to_ptr.vmem [resolvable:$true] %s596_s5 }
 0x121   :  { %v354_v27 = vmax.f32 %v313_v23, 0.0  ;;  %v316_v28 = vpop.f32.mrb[4].mxu0  ;;  %v388_v20 = vpop.permute.xlu0 %387  ;;  %s766_s18 = scalar_lea.vmem %s597_s5, 32  ;;  %p771_p1 = scmp.lt.s32.totalorder %s597_s5, %s597_s5 }
 0x122   :  { %v318_v29 = vpop.f32.mrb[5].mxu0  ;;  %v746_v30 = vpack.c.bf16 %v353_v25, %v351_v24  ;;  %v317_v32 = vadd.f32 %v316_v28, %v90_v22  ;;  %v393_v24 = vpop.permute.xlu1 %392  ;;  %p767_p0 = scmp.ne.s32.totalorder %s597_s5, %s766_s18  ;;  %p772_p2 = scmp.lt.s32.totalorder %s766_s18, %s766_s18 }
 0x123   :  { %v744_v31 = vpack.c.bf16 %v354_v27, %v352_v26  ;;  %v319_v34 = vadd.f32 %v318_v29, %v90_v22 }
 0x124   :  { %v355_v39 = vmax.f32 %v317_v32, 0.0  ;;  %p773_p3 = por %p772_p2, %p771_p1 }
 0x125   :  { %v322_v35 = vpop.f32.mrb[6].mxu0  ;;  %745 = vmatprep.subr.bf16.mxu1 %v744_v31  ;;  %v356_v41 = vmax.f32 %v319_v34, 0.0 }
 0x126   :  { %v323_v36 = vadd.f32 %v322_v35, %v95_v33  ;;  %v324_v37 = vpop.f32.mrb[7].mxu0  ;;  %747 = vmatpush1.bf16.msra.mxu1 %v746_v30  ;;  %v512_v30 = vpop.permute.xlu0 %511  ;;  %p774_p4 = pnand %p773_p3, %p767_p0 }
 0x127   :  { %v325_v38 = vadd.f32 %v324_v37, %v95_v33  ;;  %v517_v33 = vpop.permute.xlu1 %516 }
 0x128   :  { %v357_v40 = vmax.f32 %v323_v36, 0.0 }
 0x129   :  { %v358_v42 = vmax.f32 %v325_v38, 0.0  ;;  %v328_v43 = vpop.f32.mrb[8].mxu0 }
 0x12a   :  { %v750_v44 = vpack.c.bf16 %v357_v40, %v355_v39  ;;  %v330_v45 = vpop.f32.mrb[9].mxu0  ;;  %v329_v48 = vadd.f32 %v328_v43, %v100_v46 }
 0x12b   :  { %v748_v47 = vpack.c.bf16 %v358_v42, %v356_v41  ;;  %v331_v50 = vadd.f32 %v330_v45, %v100_v46  ;;  %v522_v45 = vpop.permute.xlu0 %521 }
 0x12c   :  { %v359_v55 = vmax.f32 %v329_v48, 0.0 }
 0x12d   :  { %v334_v51 = vpop.f32.mrb[10].mxu0  ;;  %749 = vmatprep.subr.bf16.mxu1 %v748_v47  ;;  %v360_v57 = vmax.f32 %v331_v50, 0.0 }
 0x12e   :  { %v335_v52 = vadd.f32 %v334_v51, %v105_v49  ;;  %v336_v53 = vpop.f32.mrb[11].mxu0  ;;  %751 = vmatpush1.bf16.msra.mxu1 %v750_v44 }
 0x12f   :  { %v337_v54 = vadd.f32 %v336_v53, %v105_v49 }
 0x130   :  { %v361_v56 = vmax.f32 %v335_v52, 0.0 }
 0x131   :  { %v362_v58 = vmax.f32 %v337_v54, 0.0  ;;  %v340_v59 = vpop.f32.mrb[12].mxu0 }
 0x132   :  { %v754_v60 = vpack.c.bf16 %v361_v56, %v359_v55  ;;  %v342_v61 = vpop.f32.mrb[13].mxu0  ;;  %v341_v0 = vadd.f32 %v340_v59, %v110_v62  ;;  %v527_v56 = vpop.permute.xlu1 %526 }
 0x133   :  { %v752_v63 = vpack.c.bf16 %v362_v58, %v360_v57  ;;  %v343_v2 = vadd.f32 %v342_v61, %v110_v62  ;;  %v561_v61 = vlaneseq }
 0x134   :  { %v363_v5 = vmax.f32 %v341_v0, 0.0 }
 0x135   :  { %v346_v3 = vpop.f32.mrb[14].mxu0  ;;  %753 = vmatprep.subr.bf16.mxu1 %v752_v63  ;;  %v364_v9 = vmax.f32 %v343_v2, 0.0  ;;  %v562_v2 = vshrl.u32 %v561_v61, 7  ;;  %vm587_vm3 = vcmp.lt.s32.totalorder %v561_v61, 256 }
 0x136   :  { %v347_v4 = vadd.f32 %v346_v3, %v115_v1  ;;  %v348_v6 = vpop.f32.mrb[15].mxu0  ;;  %755 = vmatpush1.bf16.msra.mxu1 %v754_v60 }
 0x137   :  { %v349_v7 = vadd.f32 %v348_v6, %v115_v1 }
 0x138   :  { %v365_v8 = vmax.f32 %v347_v4, 0.0 }
 0x139   :  { %v366_v10 = vmax.f32 %v349_v7, 0.0 }
 0x13a   :  { %v758_v11 = vpack.c.bf16 %v365_v8, %v363_v5  ;;  %v792_v5 = vmov 1966171168  }
 0x13b   :  { %v756_v13 = vpack.c.bf16 %v366_v10, %v364_v9  ;;  %v571_v8 = vunpack.c.l.s4 %v792_v5  ;;  %v563_v9 = vsub.s32 0, %v562_v2 }
 0x13d   :  { %757 = vmatprep.subr.bf16.mxu1 %v756_v13 }
 0x13e   :  { %759 = vmatpush1.bf16.msra.mxu1 %v758_v11  ;;  %v559_v11 = vpop.permute.xlu0 %558 }
 0x141   :  { %644 = vmatmul.mubr.msk.f32.vlgmr.msra.gmra.mrb[0].mxu1 %vm395_vm2, %v367_v14 }
 0x142   :  { %478 = vmatprep.mubr.f32.mxu1 %v791_v12 }
 0x145   :  { %645 = vmatmul.mubr.msk.f32.gmra.mrb[2].mxu1 %vm395_vm2, %v368_v15 }
 0x146   :  { %484 = vmatprep.mubr.f32.mxu1 %v791_v12 }
 0x149   :  { %646 = vmatmul.mubr.msk.f32.gmra.mrb[4].mxu1 %vm395_vm2, %v369_v16  ;;  %v572_v16 = vunpack.c.0.s8 %v571_v8 }
 0x14a   :  { %490 = vmatprep.mubr.f32.mxu1 %v791_v12 }
 0x14d   :  { %647 = vmatmul.mubr.msk.f32.gmra.mrb[6].mxu1 %vm395_vm2, %v370_v17  ;;  %v564_v17 = vrot.slane %v559_v11, %v563_v9 }
 0x214   :  { %v474_v21 = vpop.f32.mrb[0].mxu1 }
 0x215   :  { %v475_v22 = vadd.f32 %v474_v21, %v378_v18  ;;  %v476_v23 = vpop.f32.mrb[1].mxu1 }
 0x216   :  { %v477_v25 = vadd.f32 %v476_v23, %v378_v18 }
 0x217   :  { %v497_v27 = vmax.f32 %v475_v22, 0.0  ;;  %v575_v22 = vsub.s32 %v572_v16, %v562_v2 }
 0x218   :  { %v480_v26 = vpop.f32.mrb[2].mxu1  ;;  %v498_v31 = vmax.f32 %v477_v25, 0.0 }
 0x219   :  { %v481_v28 = vadd.f32 %v480_v26, %v383_v19  ;;  %v482_v29 = vpop.f32.mrb[3].mxu1  ;;  %v529_v36 = vmul.f32 %v512_v30, %v497_v27 }
 0x21a   :  { %v483_v12 = vadd.f32 %v482_v29, %v383_v19  ;;  %v530_v40 = vmul.f32 %v512_v30, %v498_v31 }
 0x21b   :  { %v499_v32 = vmax.f32 %v481_v28, 0.0 }
 0x21c   :  { %v500_v34 = vmax.f32 %v483_v12, 0.0  ;;  %v486_v35 = vpop.f32.mrb[4].mxu1 }
 0x21d   :  { %v531_v37 = vmul.f32 %v517_v33, %v499_v32  ;;  %v487_v38 = vadd.f32 %v486_v35, %v388_v20  ;;  %v488_v39 = vpop.f32.mrb[5].mxu1 }
 0x21e   :  { %v532_v41 = vmul.f32 %v517_v33, %v500_v34  ;;  %v489_v42 = vadd.f32 %v488_v39, %v388_v20 }
 0x21f   :  { %v537_v43 = vadd.f32 %v531_v37, %v529_v36  ;;  %v501_v44 = vmax.f32 %v487_v38, 0.0 }
 0x220   :  { %v546_v46 = vadd.f32 %v532_v41, %v530_v40  ;;  %v502_v47 = vmax.f32 %v489_v42, 0.0  ;;  %v492_v48 = vpop.f32.mrb[6].mxu1 }
 0x221   :  { %v533_v49 = vmul.f32 %v522_v45, %v501_v44  ;;  %v493_v50 = vadd.f32 %v492_v48, %v393_v24  ;;  %v494_v51 = vpop.f32.mrb[7].mxu1 }
 0x222   :  { %v534_v52 = vmul.f32 %v522_v45, %v502_v47  ;;  %v495_v53 = vadd.f32 %v494_v51, %v393_v24 }
 0x223   :  { %v538_v54 = vadd.f32 %v537_v43, %v533_v49  ;;  %v503_v55 = vmax.f32 %v493_v50, 0.0 }
 0x224   :  { %v547_v57 = vadd.f32 %v546_v46, %v534_v52  ;;  %v504_v58 = vmax.f32 %v495_v53, 0.0 }
 0x225   :  { %v535_v59 = vmul.f32 %v527_v56, %v503_v55 }
 0x226   :  { %v536_v60 = vmul.f32 %v527_v56, %v504_v58 }
 0x227   :  { %v539_v62 = vadd.f32 %v538_v54, %v535_v59 }
 0x228   :  { %v548_v63 = vadd.f32 %v547_v57, %v536_v60 }
 0x229   :  { %v540_v0 = vrot.slane %v539_v62, 4 }
 0x22a   :  { %v549_v1 = vrot.slane %v548_v63, 4 }
 0x22b   :  { %v541_v3 = vadd.f32 %v540_v0, %v539_v62 }
 0x22c   :  { %v550_v4 = vadd.f32 %v549_v1, %v548_v63 }
 0x22d   :  { %v542_v6 = vrot.slane %v541_v3, 2 }
 0x22e   :  { %v551_v7 = vrot.slane %v550_v4, 2 }
 0x22f   :  { %v543_v10 = vadd.f32 %v542_v6, %v541_v3 }
 0x230   :  { %v552_v13 = vadd.f32 %v551_v7, %v550_v4 }
 0x231   :  { %v544_v14 = vrot.slane %v543_v10, 1 }
 0x232   :  { %v553_v15 = vrot.slane %v552_v13, 1 }
 0x233   :  { %v545_v18 = vadd.f32 %v544_v14, %v543_v10 }
 0x234   :  { %v554_v19 = vadd.f32 %v553_v15, %v552_v13 }
 0x235   :  { %v565_v20 = vadd.f32 %v564_v17, %v545_v18 }
 0x236   :  { %v566_v21 = vadd.f32 %v564_v17, %v554_v19 }
 0x238   :  { %v569_v23 = vcombine.low %v565_v20, %v566_v21 }
 0x23a   :  { %v576_v24 = vrot.slane %v569_v23, %v575_v22 }
 0x23c   :  { %v583_v25 = vrot.slane %v576_v24, %v575_v22 }
 0x23e   :  { %589 = vst.msk [vmem:[#allocation3] sm:$0x3] %vm587_vm3, %v583_v25 }
 0x23f   :  { %777 = shalt.err (!%p774_p4)
}
 0x240   :  { %s778_s21 = scalar_lea.hbm %s1098_s7, 32 }
 0x241   :  { %p779_p5 = scmp.ne.s32.totalorder %s1098_s7, %s778_s21  ;;  %p782_p6 = scmp.lt.u32.totalorder %s778_s21, %s1098_s7 }
 0x243   :  { %p784_p7 = pnand %p782_p6, %p779_p5 }
 0x245   :  { %787 = shalt.err (!%p784_p7)
}
 0x246   :  { %599 = dma.vmem_to_hbm [thread:$0]  %s597_s5, 32, %s1098_s7, [#allocation4]  }
 0x247   :  { %788 = dma.done.wait [#allocation4], 32  }
 0x248   :  { %789 = vsyncadd [#allocation4], 4294967264 }
 0x249   :  { %603 = vsyncpa [#allocation4], 1 }

</bundles_post_ra>
